<compile_context>
chip_gen: v7x
topology: tpu7x:2x2x1
jax: 0.10.0
libtpu: 0.0.40
codegen_flags: <defaults>
</compile_context>

<pallas_src>
import functools

import jax
import jax.numpy as jnp
from jax import lax
from jax.experimental import pallas as pl
from jax.experimental.pallas import tpu as pltpu

EPS = 1e-5  # PyTorch InstanceNorm2d default


# ----------------------------------------------------------------------------
# Pallas kernel: fused upsample+pad+conv (2 dense matmuls) + InstanceNorm (2
# tiny matmuls for stats, 1 for the affine broadcast) + ReLU.  One batch chunk
# of `bc` samples per grid step.
# ----------------------------------------------------------------------------
def _upconv_kernel(x_ref, g_ref, a_ref, gamma_ref, beta_ref, pool_ref,
                   bcast_ref, o_ref, *, bc, h2):
    # x_ref    : (bc*H,  W*Cin)        input rows, (W, Cin) packed on lanes
    # g_ref    : (W*Cin, 3*W2*Cout)    fused width/conv operator, ky on the N axis
    # a_ref    : (bc*H2, 3*bc*H)       fused height operator (ky blocks, per-sample
    #                                  block-diagonal within the chunk)
    # gamma_ref, beta_ref : (1, Cout)  InstanceNorm affine
    # pool_ref : (W2*Cout, Cout)       packed-lane -> channel 0/1 pooling
    # bcast_ref: (Cout, W2*Cout)       channel -> packed-lane 0/1 broadcast
    # o_ref    : (bc*H2, W2*Cout)      lane-dense packed output
    wc2 = o_ref.shape[1]
    cout = gamma_ref.shape[1]
    inv_n = 1.0 / float(h2 * (wc2 // cout))

    # Stage 1: one matmul (K = W*Cin) covering all three ky taps.
    x = x_ref[...]
    t_wide = jnp.dot(x, g_ref[...],
                     preferred_element_type=jnp.float32)        # (bc*H, 3*W2*Cout)

    # Re-pack ky from lanes to rows.  Lane slices are at multiples of W2*Cout
    # (multiple of 128 lanes) and row counts are multiples of 8, so this is a
    # cheap tile-aligned placement.
    t_stack = jnp.concatenate(
        [t_wide[:, ky * wc2:(ky + 1) * wc2] for ky in range(3)],
        axis=0).astype(a_ref.dtype)                             # (3*bc*H, W2*Cout)

    # Stage 2: one matmul (K = 3*bc*H).  Conv bias omitted: it is exactly
    # cancelled by the InstanceNorm mean subtraction below.
    pre = jnp.dot(a_ref[...], t_stack,
                  preferred_element_type=jnp.float32)           # (bc*H2, W2*Cout)

    # InstanceNorm2d: single-pass per-sample, per-channel stats.
    # (E[x^2]-E[x]^2 is fine at these magnitudes with f32 accumulation.)
    sums, sqs = [], []
    for b in range(bc):                                         # static unroll
        rows = pre[b * h2:(b + 1) * h2]                         # sublane-aligned
        sums.append(jnp.sum(rows, axis=0, keepdims=True))
        sqs.append(jnp.sum(rows * rows, axis=0, keepdims=True))
    stats_l = jnp.concatenate(sums + sqs, axis=0)               # (2*bc, W2*Cout)
    stats_c = jnp.dot(stats_l, pool_ref[...],
                      preferred_element_type=jnp.float32)       # (2*bc, Cout)

    mean = stats_c[:bc] * inv_n                                 # (bc, Cout)
    var = stats_c[bc:] * inv_n - mean * mean                    # biased variance
    scale = gamma_ref[...] * lax.rsqrt(var + EPS)               # (bc, Cout)
    shift = beta_ref[...] - mean * scale                        # (bc, Cout)

    # One matmul broadcasts both scale and shift onto the packed lane axis.
    ss_l = jnp.dot(jnp.concatenate([scale, shift], axis=0), bcast_ref[...],
                   preferred_element_type=jnp.float32)          # (2*bc, W2*Cout)

    # Affine + ReLU + lane-dense store (256 lanes -> unmasked vst).
    for b in range(bc):                                         # static unroll
        rows = pre[b * h2:(b + 1) * h2]
        o_ref[pl.ds(b * h2, h2), :] = jnp.maximum(
            rows * ss_l[b:b + 1] + ss_l[bc + b:bc + b + 1], 0.0)


# ----------------------------------------------------------------------------
# Wrapper-side (data-independent) parameter folding and layout plumbing.
# ----------------------------------------------------------------------------
def _interp_matrix(n_in: int, n_out: int) -> jnp.ndarray:
    # align_corners=True (matches the module's F.interpolate call):
    #   src = dst * (n_in - 1) / (n_out - 1).  n_out = 2*n_in >= 2, so no /0;
    #   n_in == 1 degenerates gracefully (src == 0 everywhere).
    src = jnp.arange(n_out, dtype=jnp.float32) * (n_in - 1) / max(n_out - 1, 1)
    i0 = jnp.clip(jnp.floor(src).astype(jnp.int32), 0, n_in - 1)
    i1 = jnp.clip(i0 + 1, 0, n_in - 1)
    frac = src - i0.astype(jnp.float32)
    return ((1.0 - frac)[:, None] * jax.nn.one_hot(i0, n_in, dtype=jnp.float32)
            + frac[:, None] * jax.nn.one_hot(i1, n_in, dtype=jnp.float32))


def _fold_params(w_oihw, H: int, W: int, Bc: int):
    """Fold bilinear x2 upsample + zero padding + 3x3 conv into the two fused
    matmul operands used by the kernel (pure weight preprocessing)."""
    Cout, Cin = w_oihw.shape[0], w_oihw.shape[1]
    H2, W2 = 2 * H, 2 * W
    Ah = _interp_matrix(H, H2)                            # (H2, H)
    Aw = _interp_matrix(W, W2)                            # (W2, W)
    Ahp = jnp.pad(Ah, ((1, 1), (0, 0)))                   # zero rows == conv pad
    Awp = jnp.pad(Aw, ((1, 1), (0, 0)))
    ahk = jnp.stack([Ahp[k:k + H2] for k in range(3)], 0)  # (3, H2, H)
    awk = jnp.stack([Awp[k:k + W2] for k in range(3)], 0)  # (3, W2, W)

    w_hwio = jnp.transpose(w_oihw, (2, 3, 1, 0)).astype(jnp.float32)  # (ky,kx,ci,co)
    # g[ky, w, ci, x2, co] = sum_kx awk[kx, x2, w] * w[ky, kx, ci, co]
    g = jnp.einsum('xsw,yxic->ywisc', awk, w_hwio)        # (3, W, Cin, W2, Cout)
    # Fused stage-1 operator: K = (w, ci), N = (ky, x2, co).
    g_cat = jnp.transpose(g, (1, 2, 0, 3, 4)).reshape(W * Cin, 3 * W2 * Cout)

    # Fused stage-2 operator for a chunk of Bc samples:
    #   A[b*H2 + y2, ky*Bc*H + b*H + h] = ahk[ky, y2, h]
    eye_b = jnp.eye(Bc, dtype=jnp.float32)
    a_blk = jnp.einsum('kyh,pq->pykqh', ahk, eye_b).reshape(Bc * H2, 3 * Bc * H)
    return g_cat, a_blk


def _tensorcores_per_chip() -> int:
    # v7x has 2 TensorCores per chip; v5e/v6e have 1.  Fall back to 1 on doubt.
    try:
        kind = jax.devices()[0].device_kind.lower()
    except Exception:
        return 1
    return 2 if ('v7' in kind or '7x' in kind) else 1


def upconv(x_nchw, w_oihw, bias, gamma, beta, *, samples_per_step=None,
           matmul_dtype=jnp.float32):
    # `bias` kept for API parity with the PyTorch module, but unused:
    # InstanceNorm's per-channel mean subtraction cancels it exactly.
    del bias
    B, Cin, H, W = x_nchw.shape
    Cout = w_oihw.shape[0]
    H2, W2 = 2 * H, 2 * W
    WC, WC2 = W * Cin, W2 * Cout

    if samples_per_step is None:
        n_tc = _tensorcores_per_chip()
        if n_tc > 1 and B % n_tc == 0:
            samples_per_step = B // n_tc   # one chunk per TensorCore (v7x)
        else:
            samples_per_step = B           # single grid step on 1-TC chips
    Bc = int(samples_per_step)
    assert B % Bc == 0, (B, Bc)
    n_steps = B // Bc

    g_cat, a_blk = _fold_params(w_oihw, H, W, Bc)

    # Lane-dense input packing: rows = (b, h), lanes = (w, ci).
    x_packed = jnp.transpose(x_nchw, (0, 2, 3, 1)).reshape(B * H, WC)
    x_packed = x_packed.astype(matmul_dtype)
    g_cat = g_cat.astype(matmul_dtype)
    a_blk = a_blk.astype(matmul_dtype)

    gamma2 = gamma.reshape(1, Cout).astype(jnp.float32)
    beta2 = beta.reshape(1, Cout).astype(jnp.float32)

    # Channel <-> packed-lane 0/1 selection matrices (pool's 8-lane tile pads to
    # 128 lanes in VMEM; trivial at this size).
    eye = jnp.eye(Cout, dtype=jnp.float32)
    bcast = jnp.tile(eye, (1, W2))                        # (Cout, W2*Cout)
    pool = bcast.T                                        # (W2*Cout, Cout)

    kernel = functools.partial(_upconv_kernel, bc=Bc, h2=H2)

    out_packed = pl.pallas_call(
        kernel,
        out_shape=jax.ShapeDtypeStruct((B * H2, WC2), jnp.float32),
        grid_spec=pltpu.PrefetchScalarGridSpec(
            num_scalar_prefetch=0,
            grid=(n_steps,),
            in_specs=[
                pl.BlockSpec((Bc * H, WC), lambda i: (i, 0)),
                pl.BlockSpec((WC, 3 * WC2), lambda i: (0, 0)),
                pl.BlockSpec((Bc * H2, 3 * Bc * H), lambda i: (0, 0)),
                pl.BlockSpec((1, Cout), lambda i: (0, 0)),
                pl.BlockSpec((1, Cout), lambda i: (0, 0)),
                pl.BlockSpec((WC2, Cout), lambda i: (0, 0)),
                pl.BlockSpec((Cout, WC2), lambda i: (0, 0)),
            ],
            out_specs=pl.BlockSpec((Bc * H2, WC2), lambda i: (i, 0)),
        ),
        compiler_params=pltpu.CompilerParams(
            dimension_semantics=("parallel",),
            vmem_limit_bytes=32 * 1024 * 1024),
    )(x_packed, g_cat, a_blk, gamma2, beta2, pool, bcast)

    out_nhwc = out_packed.reshape(B, H2, W2, Cout)
    return jnp.transpose(out_nhwc, (0, 3, 1, 2))          # back to NCHW


# ----------------------------------------------------------------------------
# Pure-JAX reference (same math as the PyTorch module) for validation.
# ----------------------------------------------------------------------------
def _bilinear_up2x(x_nchw):
    B, C, H, W = x_nchw.shape
    Ah = _interp_matrix(H, 2 * H)
    Aw = _interp_matrix(W, 2 * W)
    xf = x_nchw.astype(jnp.float32)
    up = jnp.einsum('Oh,bchw->bcOw', Ah, xf)
    up = jnp.einsum('Pw,bcOw->bcOP', Aw, up)
    return up


def _reference(x_nchw, w_oihw, bias, gamma, beta):
    up = _bilinear_up2x(x_nchw)
    y = lax.conv_general_dilated(
        up, w_oihw.astype(jnp.float32), (1, 1), 'SAME',
        dimension_numbers=('NCHW', 'OIHW', 'NCHW'))
    y = y + bias[None, :, None, None]
    mean = jnp.mean(y, axis=(2, 3), keepdims=True)
    var = jnp.mean(jnp.square(y - mean), axis=(2, 3), keepdims=True)
    y = (y - mean) * lax.rsqrt(var + EPS)
    y = y * gamma[None, :, None, None] + beta[None, :, None, None]
    return jnp.maximum(y, 0.0)


if __name__ == "__main__":
    B, Cin, Cout, H, W = 2, 4, 8, 16, 16

    key = jax.random.PRNGKey(0)
    kx, kw, kb, kg, kbe = jax.random.split(key, 5)

    x = jax.random.normal(kx, (B, Cin, H, W), dtype=jnp.float32)
    # Conv2d(in_ch=4, out_ch=8, k=3) parameters (deterministic synthetic init)
    conv_w = 0.1 * jax.random.normal(kw, (Cout, Cin, 3, 3), dtype=jnp.float32)
    conv_b = 0.1 * jax.random.normal(kb, (Cout,), dtype=jnp.float32)
    # InstanceNorm2d(out_ch, affine=True) parameters
    gamma = 1.0 + 0.1 * jax.random.normal(kg, (Cout,), dtype=jnp.float32)
    beta = 0.1 * jax.random.normal(kbe, (Cout,), dtype=jnp.float32)

    ref = _reference(x, conv_w, conv_b, gamma, beta)

    # Validate the auto-selected path plus both explicit chunkings
    # (Bc=1 -> grid=(B,) "parallel" for v7x; Bc=B -> single grid step for
    #  single-TensorCore v5e/v6e), so both code paths are exercised regardless
    # of which chip this runs on.
    for spp in (None, 1, B):
        out = upconv(x, conv_w, conv_b, gamma, beta, samples_per_step=spp)
        out = jax.block_until_ready(out)
        assert out.shape == (B, Cout, 2 * H, 2 * W), out.shape
        max_err = float(jnp.max(jnp.abs(out - ref)))
        assert max_err < 1e-3, f"spp={spp}: mismatch vs reference, max_err={max_err}"

    print("KERNEL_OK")
</pallas_src>

<mosaic_0001>
module attributes {stable_mosaic.version = 11 : i64} {
  func.func @_upconv_kernel(%arg0: i32, %arg1: memref<32x64xf32, #tpu.memory_space<vmem>>, %arg2: memref<64x768xf32, #tpu.memory_space<vmem>>, %arg3: memref<64x96xf32, #tpu.memory_space<vmem>>, %arg4: memref<1x8xf32, #tpu.memory_space<vmem>>, %arg5: memref<1x8xf32, #tpu.memory_space<vmem>>, %arg6: memref<256x8xf32, #tpu.memory_space<vmem>>, %arg7: memref<8x256xf32, #tpu.memory_space<vmem>>, %arg8: memref<64x256xf32, #tpu.memory_space<vmem>>) attributes {dimension_semantics = [#tpu.dimension_semantics<parallel>], iteration_bounds = array<i64: 1>, scalar_prefetch = 0 : i64, scratch_operands = 0 : i64, tpu.core_type = #tpu.core_type<tc>, window_params = [{transform_indices = @transform_0, window_bounds = array<i64: 32, 64>}, {pipeline_mode = #tpu.pipeline_mode<synchronous>, transform_indices = @transform_1, window_bounds = array<i64: 64, 768>}, {pipeline_mode = #tpu.pipeline_mode<synchronous>, transform_indices = @transform_2, window_bounds = array<i64: 64, 96>}, {pipeline_mode = #tpu.pipeline_mode<synchronous>, transform_indices = @transform_3, window_bounds = array<i64: 1, 8>}, {pipeline_mode = #tpu.pipeline_mode<synchronous>, transform_indices = @transform_4, window_bounds = array<i64: 1, 8>}, {pipeline_mode = #tpu.pipeline_mode<synchronous>, transform_indices = @transform_5, window_bounds = array<i64: 256, 8>}, {pipeline_mode = #tpu.pipeline_mode<synchronous>, transform_indices = @transform_6, window_bounds = array<i64: 8, 256>}, {transform_indices = @transform_7, window_bounds = array<i64: 64, 256>}]} {
    %c0 = arith.constant 0 : index
    %c0_0 = arith.constant 0 : index
    %0 = vector.load %arg1[%c0, %c0_0] : memref<32x64xf32, #tpu.memory_space<vmem>>, vector<32x64xf32>
    %c0_1 = arith.constant 0 : index
    %c0_2 = arith.constant 0 : index
    %1 = vector.load %arg2[%c0_1, %c0_2] : memref<64x768xf32, #tpu.memory_space<vmem>>, vector<64x768xf32>
    %cst = arith.constant dense<0.000000e+00> : vector<32x768xf32>
    %2 = tpu.matmul %0, %1, %cst {dimension_numbers = #tpu.dot_dimension_numbers<[1], [0], [0], [1], [0, 0, 1, 1], [], []>} : vector<32x64xf32>, vector<64x768xf32>, vector<32x768xf32> -> vector<32x768xf32>
    %3 = vector.extract_strided_slice %2 {offsets = [0, 0], sizes = [32, 256], strides = [1, 1]} : vector<32x768xf32> to vector<32x256xf32>
    %4 = vector.extract_strided_slice %2 {offsets = [0, 256], sizes = [32, 256], strides = [1, 1]} : vector<32x768xf32> to vector<32x256xf32>
    %5 = vector.extract_strided_slice %2 {offsets = [0, 512], sizes = [32, 256], strides = [1, 1]} : vector<32x768xf32> to vector<32x256xf32>
    %6 = tpu.concatenate %3, %4, %5 in 0 : vector<32x256xf32>, vector<32x256xf32>, vector<32x256xf32> -> vector<96x256xf32>
    %c0_3 = arith.constant 0 : index
    %c0_4 = arith.constant 0 : index
    %7 = vector.load %arg3[%c0_3, %c0_4] : memref<64x96xf32, #tpu.memory_space<vmem>>, vector<64x96xf32>
    %cst_5 = arith.constant dense<0.000000e+00> : vector<64x256xf32>
    %8 = tpu.matmul %7, %6, %cst_5 {dimension_numbers = #tpu.dot_dimension_numbers<[1], [0], [0], [1], [0, 0, 1, 1], [], []>} : vector<64x96xf32>, vector<96x256xf32>, vector<64x256xf32> -> vector<64x256xf32>
    %9 = vector.extract_strided_slice %8 {offsets = [0, 0], sizes = [32, 256], strides = [1, 1]} : vector<64x256xf32> to vector<32x256xf32>
    %cst_6 = arith.constant dense<0.000000e+00> : vector<256xf32>
    %10 = vector.multi_reduction <add>, %9, %cst_6 [0] : vector<32x256xf32> to vector<256xf32>
    %11 = vector.shape_cast %10 : vector<256xf32> to vector<1x256xf32>
    %12 = arith.mulf %9, %9 : vector<32x256xf32>
    %cst_7 = arith.constant dense<0.000000e+00> : vector<256xf32>
    %13 = vector.multi_reduction <add>, %12, %cst_7 [0] : vector<32x256xf32> to vector<256xf32>
    %14 = vector.shape_cast %13 : vector<256xf32> to vector<1x256xf32>
    %15 = vector.extract_strided_slice %8 {offsets = [32, 0], sizes = [32, 256], strides = [1, 1]} : vector<64x256xf32> to vector<32x256xf32>
    %cst_8 = arith.constant dense<0.000000e+00> : vector<256xf32>
    %16 = vector.multi_reduction <add>, %15, %cst_8 [0] : vector<32x256xf32> to vector<256xf32>
    %17 = vector.shape_cast %16 : vector<256xf32> to vector<1x256xf32>
    %18 = arith.mulf %15, %15 : vector<32x256xf32>
    %cst_9 = arith.constant dense<0.000000e+00> : vector<256xf32>
    %19 = vector.multi_reduction <add>, %18, %cst_9 [0] : vector<32x256xf32> to vector<256xf32>
    %20 = vector.shape_cast %19 : vector<256xf32> to vector<1x256xf32>
    %21 = tpu.concatenate %11, %17, %14, %20 in 0 : vector<1x256xf32>, vector<1x256xf32>, vector<1x256xf32>, vector<1x256xf32> -> vector<4x256xf32>
    %c0_10 = arith.constant 0 : index
    %c0_11 = arith.constant 0 : index
    %22 = vector.load %arg6[%c0_10, %c0_11] : memref<256x8xf32, #tpu.memory_space<vmem>>, vector<256x8xf32>
    %cst_12 = arith.constant dense<0.000000e+00> : vector<4x8xf32>
    %23 = tpu.matmul %21, %22, %cst_12 {dimension_numbers = #tpu.dot_dimension_numbers<[1], [0], [0], [1], [0, 0, 1, 1], [], []>} : vector<4x256xf32>, vector<256x8xf32>, vector<4x8xf32> -> vector<4x8xf32>
    %24 = vector.extract_strided_slice %23 {offsets = [0, 0], sizes = [2, 8], strides = [1, 1]} : vector<4x8xf32> to vector<2x8xf32>
    %cst_13 = arith.constant 9.765625E-4 : f32
    %25 = vector.broadcast %cst_13 : f32 to vector<2x8xf32>
    %26 = arith.mulf %24, %25 : vector<2x8xf32>
    %27 = vector.extract_strided_slice %23 {offsets = [2, 0], sizes = [2, 8], strides = [1, 1]} : vector<4x8xf32> to vector<2x8xf32>
    %cst_14 = arith.constant 9.765625E-4 : f32
    %28 = vector.broadcast %cst_14 : f32 to vector<2x8xf32>
    %29 = arith.mulf %27, %28 : vector<2x8xf32>
    %30 = arith.mulf %26, %26 : vector<2x8xf32>
    %31 = arith.subf %29, %30 : vector<2x8xf32>
    %c0_15 = arith.constant 0 : index
    %c0_16 = arith.constant 0 : index
    %32 = vector.load %arg4[%c0_15, %c0_16] : memref<1x8xf32, #tpu.memory_space<vmem>>, vector<1x8xf32>
    %cst_17 = arith.constant 9.99999974E-6 : f32
    %33 = vector.broadcast %cst_17 : f32 to vector<2x8xf32>
    %34 = arith.addf %31, %33 : vector<2x8xf32>
    %35 = math.rsqrt %34 : vector<2x8xf32>
    %36 = vector.broadcast %32 : vector<1x8xf32> to vector<2x8xf32>
    %37 = arith.mulf %36, %35 : vector<2x8xf32>
    %c0_18 = arith.constant 0 : index
    %c0_19 = arith.constant 0 : index
    %38 = vector.load %arg5[%c0_18, %c0_19] : memref<1x8xf32, #tpu.memory_space<vmem>>, vector<1x8xf32>
    %39 = arith.mulf %26, %37 : vector<2x8xf32>
    %40 = vector.broadcast %38 : vector<1x8xf32> to vector<2x8xf32>
    %41 = arith.subf %40, %39 : vector<2x8xf32>
    %42 = tpu.concatenate %37, %41 in 0 : vector<2x8xf32>, vector<2x8xf32> -> vector<4x8xf32>
    %c0_20 = arith.constant 0 : index
    %c0_21 = arith.constant 0 : index
    %43 = vector.load %arg7[%c0_20, %c0_21] : memref<8x256xf32, #tpu.memory_space<vmem>>, vector<8x256xf32>
    %cst_22 = arith.constant dense<0.000000e+00> : vector<4x256xf32>
    %44 = tpu.matmul %42, %43, %cst_22 {dimension_numbers = #tpu.dot_dimension_numbers<[1], [0], [0], [1], [0, 0, 1, 1], [], []>} : vector<4x8xf32>, vector<8x256xf32>, vector<4x256xf32> -> vector<4x256xf32>
    %45 = vector.extract_strided_slice %8 {offsets = [0, 0], sizes = [32, 256], strides = [1, 1]} : vector<64x256xf32> to vector<32x256xf32>
    %46 = vector.extract_strided_slice %44 {offsets = [0, 0], sizes = [1, 256], strides = [1, 1]} : vector<4x256xf32> to vector<1x256xf32>
    %47 = vector.broadcast %46 : vector<1x256xf32> to vector<32x256xf32>
    %48 = arith.mulf %45, %47 : vector<32x256xf32>
    %49 = vector.extract_strided_slice %44 {offsets = [2, 0], sizes = [1, 256], strides = [1, 1]} : vector<4x256xf32> to vector<1x256xf32>
    %50 = vector.broadcast %49 : vector<1x256xf32> to vector<32x256xf32>
    %51 = arith.addf %48, %50 : vector<32x256xf32>
    %cst_23 = arith.constant 0.000000e+00 : f32
    %52 = vector.broadcast %cst_23 : f32 to vector<32x256xf32>
    %53 = arith.maximumf %51, %52 : vector<32x256xf32>
    %c0_24 = arith.constant 0 : index
    %c0_25 = arith.constant 0 : index
    %54 = vector.load %arg8[%c0_24, %c0_25] : memref<64x256xf32, #tpu.memory_space<vmem>>, vector<32x256xf32>
    tpu.vector_store %arg8[%c0_24, %c0_25], %53 {strides = array<i32>} : memref<64x256xf32, #tpu.memory_space<vmem>>, vector<32x256xf32>,
    %55 = vector.extract_strided_slice %8 {offsets = [32, 0], sizes = [32, 256], strides = [1, 1]} : vector<64x256xf32> to vector<32x256xf32>
    %56 = vector.extract_strided_slice %44 {offsets = [1, 0], sizes = [1, 256], strides = [1, 1]} : vector<4x256xf32> to vector<1x256xf32>
    %57 = vector.broadcast %56 : vector<1x256xf32> to vector<32x256xf32>
    %58 = arith.mulf %55, %57 : vector<32x256xf32>
    %59 = vector.extract_strided_slice %44 {offsets = [3, 0], sizes = [1, 256], strides = [1, 1]} : vector<4x256xf32> to vector<1x256xf32>
    %60 = vector.broadcast %59 : vector<1x256xf32> to vector<32x256xf32>
    %61 = arith.addf %58, %60 : vector<32x256xf32>
    %cst_26 = arith.constant 0.000000e+00 : f32
    %62 = vector.broadcast %cst_26 : f32 to vector<32x256xf32>
    %63 = arith.maximumf %61, %62 : vector<32x256xf32>
    %c32 = arith.constant 32 : index
    %c0_27 = arith.constant 0 : index
    %64 = vector.load %arg8[%c32, %c0_27] : memref<64x256xf32, #tpu.memory_space<vmem>>, vector<32x256xf32>
    tpu.vector_store %arg8[%c32, %c0_27], %63 {strides = array<i32>} : memref<64x256xf32, #tpu.memory_space<vmem>>, vector<32x256xf32>,
    return
  }
  func.func @transform_0(%arg0: i32) -> (i32, i32) {
    %c0_i32 = arith.constant 0 : i32
    %c0_i32_0 = arith.constant 0 : i32
    return %arg0, %c0_i32 : i32, i32
  }
  func.func @transform_1(%arg0: i32) -> (i32, i32) {
    %c0_i32 = arith.constant 0 : i32
    %c0_i32_0 = arith.constant 0 : i32
    %c0_i32_1 = arith.constant 0 : i32
    return %c0_i32, %c0_i32_0 : i32, i32
  }
  func.func @transform_2(%arg0: i32) -> (i32, i32) {
    %c0_i32 = arith.constant 0 : i32
    %c0_i32_0 = arith.constant 0 : i32
    %c0_i32_1 = arith.constant 0 : i32
    return %c0_i32, %c0_i32_0 : i32, i32
  }
  func.func @transform_3(%arg0: i32) -> (i32, i32) {
    %c0_i32 = arith.constant 0 : i32
    %c0_i32_0 = arith.constant 0 : i32
    %c0_i32_1 = arith.constant 0 : i32
    return %c0_i32, %c0_i32_0 : i32, i32
  }
  func.func @transform_4(%arg0: i32) -> (i32, i32) {
    %c0_i32 = arith.constant 0 : i32
    %c0_i32_0 = arith.constant 0 : i32
    %c0_i32_1 = arith.constant 0 : i32
    return %c0_i32, %c0_i32_0 : i32, i32
  }
  func.func @transform_5(%arg0: i32) -> (i32, i32) {
    %c0_i32 = arith.constant 0 : i32
    %c0_i32_0 = arith.constant 0 : i32
    %c0_i32_1 = arith.constant 0 : i32
    return %c0_i32, %c0_i32_0 : i32, i32
  }
  func.func @transform_6(%arg0: i32) -> (i32, i32) {
    %c0_i32 = arith.constant 0 : i32
    %c0_i32_0 = arith.constant 0 : i32
    %c0_i32_1 = arith.constant 0 : i32
    return %c0_i32, %c0_i32_0 : i32, i32
  }
  func.func @transform_7(%arg0: i32) -> (i32, i32) {
    %c0_i32 = arith.constant 0 : i32
    %c0_i32_0 = arith.constant 0 : i32
    return %arg0, %c0_i32 : i32, i32
  }
}

</mosaic_0001>

<bundles_post_ra>
// kernel: tpu_custom_call.1
= control target key start
LH: loop header
LB: loop body
LE: loop exit
PB: predicated region body
PF: predicated region fallthrough
CT: control target
= control target key end

     0   :  { %12 = vsyncpa [#allocation3], 0  ;;  %s1514_s0 = inlined_call_operand.vmem [shape: f32[32,64], index: 0, kind: input, shape index: {}]   ;;  %s1515_s1 = inlined_call_operand.hbm [shape: f32[64,768], index: 1, kind: input, shape index: {}]   ;;  %s1516_s2 = inlined_call_operand.vmem [shape: f32[64,96], index: 2, kind: input, shape index: {}]   ;;  %s1517_s3 = inlined_call_operand.vmem [shape: f32[1,8], index: 3, kind: input, shape index: {}]   ;;  %s1518_s4 = inlined_call_operand.vmem [shape: f32[1,8], index: 4, kind: input, shape index: {}]   ;;  %s1519_s5 = inlined_call_operand.vmem [shape: f32[256,8], index: 5, kind: input, shape index: {}]   ;;  %s1520_s6 = inlined_call_operand.vmem [shape: f32[8,256], index: 6, kind: input, shape index: {}]   ;;  %s1521_s7 = inlined_call_operand.hbm [shape: f32[64,256], index: 7, kind: output, shape index: {}]  }
   0x1   :  { %13 = vsyncpa [#allocation4], 0  ;;  %s1159_s24 = smov [#allocation2]   ;;  %s1111_s28 = scalar_lea.hbm %s1515_s1, 6144 }
   0x2   :  { %s21_s25 = sshll.u32 %s1159_s24, 4  ;;  %p1112_p0 = scmp.ne.s32.totalorder %s1515_s1, %s1111_s28  ;;  %s22_s25 = int_to_ptr.vmem [resolvable:$true] %s21_s25 }
   0x3   :  { %p1115_p1 = scmp.lt.u32.totalorder %s1111_s28, %s1515_s1 }
   0x5   :  { %p1117_p2 = pnand %p1115_p1, %p1112_p0 }
   0x7   :  { %1120 = shalt.err (!%p1117_p2)
}
   0x8   :  { %s1121_s10 = scalar_lea.vmem %s22_s25, 6144  ;;  %p1126_p4 = scmp.lt.s32.totalorder %s22_s25, %s22_s25 }
   0x9   :  { %p1122_p3 = scmp.ne.s32.totalorder %s22_s25, %s1121_s10  ;;  %p1127_p5 = scmp.lt.s32.totalorder %s1121_s10, %s1121_s10 }
   0xb   :  { %p1128_p6 = por %p1127_p5, %p1126_p4 }
   0xd   :  { %p1129_p7 = pnand %p1128_p6, %p1122_p3 }
   0xf   :  { %1132 = shalt.err (!%p1129_p7)
}
  0x10   :  { %s1160_s11 = smov 768   ;;  %s1161_s12 = smov 48  }
  0x11   :  { %27 = dma.hbm_to_vmem [thread:$0]  %s1515_s1, 6144, %s22_s25, [#allocation3], %s1160_s11, %s1160_s11, %s1161_s12  }
  0x12   :  { %1155 = dma.done.wait [#allocation3], 6144  }
  0x13   :  { %1156 = vsyncadd [#allocation3], 4294961152  ;;  %v1162_v0 = vmov 0.0   ;;  %v46_v1 = vld [vmem:[#allocation2 + $0x8] sm:$0xff]  ;;  %v52_v2 = vld [vmem:[#allocation2 + $0x38] sm:$0xff]  ;;  %vm93_vm0 = vcmask 523264  }
  0x14   :  { %170 = vmatprep.mubr.f32.mxu0 %v1162_v0  ;;  %259 = vmatprep.mubr.f32.mxu1 %v1162_v0  ;;  %v45_v3 = vld [vmem:[#allocation2] sm:$0xff]  ;;  %v998_v4 = vpack.c.bf16 %v52_v2, %v46_v1  ;;  %v51_v5 = vld [vmem:[#allocation2 + $0x30] sm:$0xff]  ;;  %v58_v6 = vld [vmem:[#allocation2 + $0x68] sm:$0xff]  ;;  %vm381_vm1 = vcmask 785408   ;;  %vm607_vm2 = vcmask 1040384   ;;  %vm610_vm3 = vcmask 1041408  }
  0x15   :  { %v64_v7 = vld [vmem:[#allocation2 + $0x98] sm:$0xff]  ;;  %v1000_v8 = vpack.c.bf16 %v51_v5, %v45_v3  ;;  %v54_v11 = vld [vmem:[#allocation2 + $0x48] sm:$0xff]  ;;  %v57_v12 = vld [vmem:[#allocation2 + $0x60] sm:$0xff]  ;;  %vm613_vm4 = vcmask 1042432   ;;  %vm752_vm5 = vcmask 64512  }
  0x16   :  { %v1002_v9 = vpack.c.bf16 %v64_v7, %v58_v6  ;;  %v48_v10 = vld [vmem:[#allocation2 + $0x18] sm:$0xff]  ;;  %999 = vmatprep.subr.bf16.mxu0 %v998_v4  ;;  %v63_v14 = vld [vmem:[#allocation2 + $0x90] sm:$0xff]  ;;  %v53_v16 = vld [vmem:[#allocation2 + $0x40] sm:$0xff] }
  0x17   :  { %v1014_v13 = vpack.c.bf16 %v54_v11, %v48_v10  ;;  %v47_v15 = vld [vmem:[#allocation2 + $0x10] sm:$0xff]  ;;  %1001 = vmatpush1.bf16.msra.mxu0 %v1000_v8  ;;  %v1004_v17 = vpack.c.bf16 %v63_v14, %v57_v12  ;;  %v70_v19 = vld [vmem:[#allocation2 + $0xc8] sm:$0xff]  ;;  %v76_v20 = vld [vmem:[#allocation2 + $0xf8] sm:$0xff] }
  0x18   :  { %v1016_v18 = vpack.c.bf16 %v53_v16, %v47_v15  ;;  %v60_v21 = vld [vmem:[#allocation2 + $0x78] sm:$0xff]  ;;  %1003 = vmatprep.subr.bf16.mxu0 %v1002_v9  ;;  %v1006_v22 = vpack.c.bf16 %v76_v20, %v70_v19  ;;  %v66_v23 = vld [vmem:[#allocation2 + $0xa8] sm:$0xff]  ;;  %v69_v24 = vld [vmem:[#allocation2 + $0xc0] sm:$0xff] }
  0x19   :  { %1015 = vmatprep.subr.bf16.mxu1 %v1014_v13  ;;  %v75_v25 = vld [vmem:[#allocation2 + $0xf0] sm:$0xff]  ;;  %v1018_v26 = vpack.c.bf16 %v66_v23, %v60_v21  ;;  %v65_v28 = vld [vmem:[#allocation2 + $0xa0] sm:$0xff]  ;;  %v82_v29 = vld [vmem:[#allocation2 + $0x128] sm:$0xff] }
  0x1a   :  { %1017 = vmatpush1.bf16.msra.mxu1 %v1016_v18  ;;  %v59_v27 = vld [vmem:[#allocation2 + $0x70] sm:$0xff]  ;;  %v88_v31 = vld [vmem:[#allocation2 + $0x158] sm:$0xff]  ;;  %v78_v33 = vld [vmem:[#allocation2 + $0x108] sm:$0xff]  ;;  %v1008_v34 = vpack.c.bf16 %v75_v25, %v69_v24 }
  0x1b   :  { %v1020_v30 = vpack.c.bf16 %v65_v28, %v59_v27  ;;  %v72_v32 = vld [vmem:[#allocation2 + $0xd8] sm:$0xff]  ;;  %1005 = vmatpush1.bf16.msra.mxu0 %v1004_v17  ;;  %1019 = vmatprep.subr.bf16.mxu1 %v1018_v26  ;;  %v81_v36 = vld [vmem:[#allocation2 + $0x120] sm:$0xff]  ;;  %v71_v37 = vld [vmem:[#allocation2 + $0xd0] sm:$0xff]  ;;  %v1010_v38 = vpack.c.bf16 %v88_v31, %v82_v29 }
  0x1c   :  { %v1022_v35 = vpack.c.bf16 %v78_v33, %v72_v32  ;;  %1007 = vmatprep.subr.bf16.mxu0 %v1006_v22  ;;  %v87_v39 = vld [vmem:[#allocation2 + $0x150] sm:$0xff]  ;;  %v77_v40 = vld [vmem:[#allocation2 + $0x100] sm:$0xff]  ;;  %v84_v41 = vld [vmem:[#allocation2 + $0x138] sm:$0xff] }
  0x1d   :  { %v1024_v42 = vpack.c.bf16 %v77_v40, %v71_v37  ;;  %v90_v43 = vld [vmem:[#allocation2 + $0x168] sm:$0xff]  ;;  %v56_v45 = vld [vmem:[#allocation2 + $0x58] sm:$0xff]  ;;  %v83_v47 = vld [vmem:[#allocation2 + $0x130] sm:$0xff]  ;;  %v1012_v49 = vpack.c.bf16 %v87_v39, %v81_v36 }
  0x1e   :  { %1021 = vmatpush1.bf16.msra.mxu1 %v1020_v30  ;;  %v50_v44 = vld [vmem:[#allocation2 + $0x28] sm:$0xff]  ;;  %v1026_v46 = vpack.c.bf16 %v90_v43, %v84_v41  ;;  %v89_v48 = vld [vmem:[#allocation2 + $0x160] sm:$0xff]  ;;  %v55_v52 = vld [vmem:[#allocation2 + $0x50] sm:$0xff] }
  0x1f   :  { %1023 = vmatprep.subr.bf16.mxu1 %v1022_v35  ;;  %1009 = vmatpush1.bf16.msra.mxu0 %v1008_v34  ;;  %v1030_v50 = vpack.c.bf16 %v56_v45, %v50_v44  ;;  %v49_v51 = vld [vmem:[#allocation2 + $0x20] sm:$0xff]  ;;  %v1028_v53 = vpack.c.bf16 %v89_v48, %v83_v47  ;;  %v62_v54 = vld [vmem:[#allocation2 + $0x88] sm:$0xff]  ;;  %v68_v55 = vld [vmem:[#allocation2 + $0xb8] sm:$0xff] }
  0x20   :  { %1011 = vmatprep.subr.bf16.mxu0 %v1010_v38  ;;  %v41_v56 = vld [vmem:[%s1514_s0] sm:$0xff]  ;;  %v1032_v57 = vpack.c.bf16 %v55_v52, %v49_v51  ;;  %v1034_v58 = vpack.c.bf16 %v68_v55, %v62_v54  ;;  %v67_v60 = vld [vmem:[#allocation2 + $0xb0] sm:$0xff]  ;;  %v74_v61 = vld [vmem:[#allocation2 + $0xe8] sm:$0xff] }
  0x21   :  { %v61_v59 = vld [vmem:[#allocation2 + $0x80] sm:$0xff]  ;;  %v80_v62 = vld [vmem:[#allocation2 + $0x118] sm:$0xff]  ;;  %v42_v63 = vld [vmem:[%s1514_s0 + $0x8] sm:$0xff] }
  0x22   :  { %1025 = vmatpush1.bf16.msra.mxu1 %v1024_v42  ;;  %v1036_v1 = vpack.c.bf16 %v67_v60, %v61_v59  ;;  %v1038_v2 = vpack.c.bf16 %v80_v62, %v74_v61  ;;  %v73_v3 = vld [vmem:[#allocation2 + $0xe0] sm:$0xff]  ;;  %v79_v4 = vld [vmem:[#allocation2 + $0x110] sm:$0xff]  ;;  %v86_v5 = vld [vmem:[#allocation2 + $0x148] sm:$0xff] }
  0x23   :  { %1027 = vmatprep.subr.bf16.mxu1 %v1026_v46  ;;  %1013 = vmatpush1.bf16.msra.mxu0 %v1012_v49  ;;  %v92_v6 = vld [vmem:[#allocation2 + $0x178] sm:$0xff]  ;;  %v43_v7 = vld [vmem:[%s1514_s0 + $0x10] sm:$0xff]  ;;  %v1040_v8 = vpack.c.bf16 %v79_v4, %v73_v3  ;;  %v85_v10 = vld [vmem:[#allocation2 + $0x140] sm:$0xff] }
  0x24   :  { %1031 = vmatprep.subr.bf16.mxu0 %v1030_v50  ;;  %v1042_v9 = vpack.c.bf16 %v92_v6, %v86_v5  ;;  %v91_v11 = vld [vmem:[#allocation2 + $0x170] sm:$0xff]  ;;  %v44_v12 = vld [vmem:[%s1514_s0 + $0x18] sm:$0xff]  ;;  %v373_v50 = vld [vmem:[%s1516_s2] sm:$0xff] }
  0x25   :  { %v1044_v13 = vpack.c.bf16 %v91_v11, %v85_v10  ;;  %v374_v51 = vld [vmem:[%s1516_s2 + $0x8] sm:$0xff]  ;;  %v375_v52 = vld [vmem:[%s1516_s2 + $0x10] sm:$0xff]  ;;  %v377_v54 = vld [vmem:[%s1516_s2 + $0x20] sm:$0xff] }
  0x26   :  { %1029 = vmatpush1.bf16.msra.mxu1 %v1028_v53  ;;  %940 = vmatmul.mubr.msk.f32.vlgmr.msra.gmra.mrb[0].mxu0 %vm93_vm0, %v41_v56  ;;  %v376_v53 = vld [vmem:[%s1516_s2 + $0x18] sm:$0xff]  ;;  %v378_v55 = vld [vmem:[%s1516_s2 + $0x28] sm:$0xff]  ;;  %v616_v61 = vld [vmem:[%s1519_s5] sm:$0xff] }
  0x27   :  { %1033 = vmatpush1.bf16.msra.mxu0 %v1032_v57  ;;  %176 = vmatprep.mubr.f32.mxu0 %v1162_v0  ;;  %v380_v57 = vld [vmem:[%s1516_s2 + $0x38] sm:$0xff]  ;;  %v633_v59 = vld [vmem:[%s1519_s5 + $0x88] sm:$0xff]  ;;  %v618_v4 = vld [vmem:[%s1519_s5 + $0x10] sm:$0xff] }
  0x28   :  { %1035 = vmatprep.subr.bf16.mxu0 %v1034_v58  ;;  %v632_v58 = vld [vmem:[%s1519_s5 + $0x80] sm:$0xff]  ;;  %v617_v62 = vld [vmem:[%s1519_s5 + $0x8] sm:$0xff]  ;;  %v619_v5 = vld [vmem:[%s1519_s5 + $0x18] sm:$0xff] }
  0x29   :  { %944 = vmatmul.mubr.msk.f32.vlgmr.msra.gmra.mrb[0].mxu1 %vm93_vm0, %v41_v56  ;;  %v1070_v60 = vpack.c.bf16 %v633_v59, %v632_v58  ;;  %v1076_v6 = vpack.c.bf16 %v619_v5, %v618_v4  ;;  %v620_v10 = vld [vmem:[%s1519_s5 + $0x20] sm:$0xff]  ;;  %v621_v11 = vld [vmem:[%s1519_s5 + $0x28] sm:$0xff] }
  0x2a   :  { %265 = vmatprep.mubr.f32.mxu1 %v1162_v0  ;;  %941 = vmatmul.mubr.msk.f32.gmra.mrb[2].mxu0 %vm93_vm0, %v42_v63 }
  0x2b   :  { %1037 = vmatpush1.bf16.msra.mxu0 %v1036_v1  ;;  %182 = vmatprep.mubr.f32.mxu0 %v1162_v0  ;;  %v634_v1 = vld [vmem:[%s1519_s5 + $0x90] sm:$0xff] }
  0x2c   :  { %1039 = vmatprep.subr.bf16.mxu0 %v1038_v2  ;;  %v635_v2 = vld [vmem:[%s1519_s5 + $0x98] sm:$0xff] }
  0x2d   :  { %945 = vmatmul.mubr.msk.f32.gmra.mrb[2].mxu1 %vm93_vm0, %v42_v63  ;;  %v1074_v3 = vpack.c.bf16 %v635_v2, %v634_v1 }
  0x2e   :  { %271 = vmatprep.mubr.f32.mxu1 %v1162_v0  ;;  %942 = vmatmul.mubr.msk.f32.gmra.mrb[4].mxu0 %vm93_vm0, %v43_v7 }
  0x2f   :  { %1041 = vmatpush1.bf16.msra.mxu0 %v1040_v8  ;;  %188 = vmatprep.mubr.f32.mxu0 %v1162_v0  ;;  %v637_v8 = vld [vmem:[%s1519_s5 + $0xa8] sm:$0xff] }
  0x30   :  { %1043 = vmatprep.subr.bf16.mxu0 %v1042_v9 }
  0x31   :  { %946 = vmatmul.mubr.msk.f32.gmra.mrb[4].mxu1 %vm93_vm0, %v43_v7 }
  0x32   :  { %277 = vmatprep.mubr.f32.mxu1 %v1162_v0  ;;  %943 = vmatmul.mubr.msk.f32.gmra.mrb[6].mxu0 %vm93_vm0, %v44_v12 }
  0x33   :  { %1045 = vmatpush1.bf16.msra.mxu0 %v1044_v13  ;;  %348 = vmatprep.mubr.f32.mxu0 %v1162_v0  ;;  %v638_v13 = vld [vmem:[%s1519_s5 + $0xb0] sm:$0xff] }
  0x34   :  { %1071 = vmatprep.subr.bf16.mxu0 %v1070_v60 }
  0x35   :  { %947 = vmatmul.mubr.msk.f32.gmra.mrb[6].mxu1 %vm93_vm0, %v44_v12 }
  0x36   :  { %470 = vmatprep.mubr.f32.mxu1 %v1162_v0  ;;  %948 = vmatmul.mubr.msk.f32.vlgmr.msra.gmra.mrb[8].mxu0 %vm93_vm0, %v41_v56  ;;  %v379_v56 = vld [vmem:[%s1516_s2 + $0x30] sm:$0xff] }
  0x37   :  { %354 = vmatprep.mubr.f32.mxu0 %v1162_v0 }
  0x3a   :  { %949 = vmatmul.mubr.msk.f32.gmra.mrb[10].mxu0 %vm93_vm0, %v42_v63  ;;  %v1072_v63 = vpack.c.bf16 %v617_v62, %v616_v61 }
  0x3b   :  { %360 = vmatprep.mubr.f32.mxu0 %v1162_v0 }
  0x3c   :  { %1073 = vmatpush3.bf16.msra.mxu0 %v1072_v63 }
  0x3d   :  { %1075 = vmatprep.subr.bf16.mxu0 %v1074_v3 }
  0x3e   :  { %950 = vmatmul.mubr.msk.f32.gmra.mrb[12].mxu0 %vm93_vm0, %v43_v7  ;;  %v636_v7 = vld [vmem:[%s1519_s5 + $0xa0] sm:$0xff] }
  0x3f   :  { %366 = vmatprep.mubr.f32.mxu0 %v1162_v0  ;;  %v1078_v9 = vpack.c.bf16 %v637_v8, %v636_v7 }
  0x40   :  { %1077 = vmatpush3.bf16.msra.mxu0 %v1076_v6 }
  0x41   :  { %1079 = vmatprep.subr.bf16.mxu0 %v1078_v9 }
  0x42   :  { %951 = vmatmul.mubr.msk.f32.gmra.mrb[14].mxu0 %vm93_vm0, %v44_v12  ;;  %v1080_v12 = vpack.c.bf16 %v621_v11, %v620_v10 }
  0x44   :  { %1081 = vmatpush3.bf16.msra.mxu0 %v1080_v12 }
  0xf9   :  { %v172_v14 = vpop.f32.mrb[0].mxu0 }
  0xfa   :  { %v174_v15 = vpop.f32.mrb[1].mxu0 }
  0xfc   :  { %v261_v16 = vpop.f32.mrb[0].mxu1 }
  0xfd   :  { %v263_v17 = vpop.f32.mrb[1].mxu1  ;;  %v178_v18 = vpop.f32.mrb[2].mxu0 }
  0xfe   :  { %v1048_v19 = vpack.c.bf16 %v178_v18, %v172_v14  ;;  %v180_v20 = vpop.f32.mrb[3].mxu0  ;;  %v639_v14 = vld [vmem:[%s1519_s5 + $0xb8] sm:$0xff] }
  0xff   :  { %v1046_v21 = vpack.c.bf16 %v180_v20, %v174_v15  ;;  %v1082_v15 = vpack.c.bf16 %v639_v14, %v638_v13  ;;  %v641_v20 = vld [vmem:[%s1519_s5 + $0xc8] sm:$0xff] }
 0x100   :  { %v267_v22 = vpop.f32.mrb[2].mxu1 }
 0x101   :  { %v1056_v23 = vpack.c.bf16 %v267_v22, %v261_v16  ;;  %v269_v24 = vpop.f32.mrb[3].mxu1  ;;  %v184_v25 = vpop.f32.mrb[4].mxu0  ;;  %1047 = vmatprep.subr.bf16.mxu1 %v1046_v21  ;;  %v622_v16 = vld [vmem:[%s1519_s5 + $0x30] sm:$0xff]  ;;  %1083 = vmatprep.subr.bf16.mxu0 %v1082_v15  ;;  %v624_v22 = vld [vmem:[%s1519_s5 + $0x40] sm:$0xff] }
 0x102   :  { %v1054_v26 = vpack.c.bf16 %v269_v24, %v263_v17  ;;  %v186_v27 = vpop.f32.mrb[5].mxu0  ;;  %1049 = vmatpush1.bf16.msra.mxu1 %v1048_v19  ;;  %v623_v17 = vld [vmem:[%s1519_s5 + $0x38] sm:$0xff]  ;;  %v640_v19 = vld [vmem:[%s1519_s5 + $0xc0] sm:$0xff] }
 0x103   :  { %v1084_v18 = vpack.c.bf16 %v623_v17, %v622_v16  ;;  %v1086_v21 = vpack.c.bf16 %v641_v20, %v640_v19 }
 0x104   :  { %v273_v28 = vpop.f32.mrb[4].mxu1 }
 0x105   :  { %v275_v29 = vpop.f32.mrb[5].mxu1  ;;  %v190_v30 = vpop.f32.mrb[6].mxu0  ;;  %1085 = vmatpush3.bf16.msra.mxu0 %v1084_v18 }
 0x106   :  { %v1052_v31 = vpack.c.bf16 %v190_v30, %v184_v25  ;;  %v192_v32 = vpop.f32.mrb[7].mxu0  ;;  %1087 = vmatprep.subr.bf16.mxu0 %v1086_v21  ;;  %v642_v25 = vld [vmem:[%s1519_s5 + $0xd0] sm:$0xff] }
 0x107   :  { %v1050_v33 = vpack.c.bf16 %v192_v32, %v186_v27  ;;  %v645_v32 = vld [vmem:[%s1519_s5 + $0xe8] sm:$0xff] }
 0x108   :  { %v279_v34 = vpop.f32.mrb[6].mxu1 }
 0x109   :  { %v1060_v35 = vpack.c.bf16 %v279_v34, %v273_v28  ;;  %v281_v36 = vpop.f32.mrb[7].mxu1  ;;  %v350_v37 = vpop.f32.mrb[8].mxu0  ;;  %1051 = vmatprep.subr.bf16.mxu1 %v1050_v33  ;;  %v626_v28 = vld [vmem:[%s1519_s5 + $0x50] sm:$0xff]  ;;  %v628_v34 = vld [vmem:[%s1519_s5 + $0x60] sm:$0xff] }
 0x10a   :  { %v1058_v38 = vpack.c.bf16 %v281_v36, %v275_v29  ;;  %v352_v39 = vpop.f32.mrb[9].mxu0  ;;  %1053 = vmatpush1.bf16.msra.mxu1 %v1052_v31  ;;  %v627_v29 = vld [vmem:[%s1519_s5 + $0x58] sm:$0xff]  ;;  %v644_v31 = vld [vmem:[%s1519_s5 + $0xe0] sm:$0xff] }
 0x10b   :  { %1055 = vmatprep.subr.bf16.mxu1 %v1054_v26  ;;  %v643_v26 = vld [vmem:[%s1519_s5 + $0xd8] sm:$0xff]  ;;  %v1092_v30 = vpack.c.bf16 %v627_v29, %v626_v28  ;;  %v1094_v33 = vpack.c.bf16 %v645_v32, %v644_v31 }
 0x10c   :  { %v1090_v27 = vpack.c.bf16 %v643_v26, %v642_v25 }
 0x10d   :  { %v356_v40 = vpop.f32.mrb[10].mxu0 }
 0x10e   :  { %v1064_v41 = vpack.c.bf16 %v356_v40, %v350_v37  ;;  %v358_v42 = vpop.f32.mrb[11].mxu0  ;;  %1057 = vmatpush1.bf16.msra.mxu1 %v1056_v23  ;;  %v625_v23 = vld [vmem:[%s1519_s5 + $0x48] sm:$0xff]  ;;  %v646_v37 = vld [vmem:[%s1519_s5 + $0xf0] sm:$0xff] }
 0x10f   :  { %v1062_v43 = vpack.c.bf16 %v358_v42, %v352_v39  ;;  %1059 = vmatprep.subr.bf16.mxu1 %v1058_v38  ;;  %v1088_v24 = vpack.c.bf16 %v625_v23, %v624_v22  ;;  %v647_v38 = vld [vmem:[%s1519_s5 + $0xf8] sm:$0xff]  ;;  %v630_v40 = vld [vmem:[%s1519_s5 + $0x70] sm:$0xff] }
 0x110   :  { %v1098_v39 = vpack.c.bf16 %v647_v38, %v646_v37 }
 0x111   :  { %v362_v44 = vpop.f32.mrb[12].mxu0  ;;  %1089 = vmatpush3.bf16.msra.mxu0 %v1088_v24 }
 0x112   :  { %v364_v45 = vpop.f32.mrb[13].mxu0  ;;  %1061 = vmatpush1.bf16.msra.mxu1 %v1060_v35  ;;  %1091 = vmatprep.subr.bf16.mxu0 %v1090_v27  ;;  %v629_v35 = vld [vmem:[%s1519_s5 + $0x68] sm:$0xff] }
 0x113   :  { %1063 = vmatprep.subr.bf16.mxu1 %v1062_v43  ;;  %v1096_v36 = vpack.c.bf16 %v629_v35, %v628_v34 }
 0x115   :  { %v368_v46 = vpop.f32.mrb[14].mxu0  ;;  %1093 = vmatpush3.bf16.msra.mxu0 %v1092_v30 }
 0x116   :  { %v1068_v47 = vpack.c.bf16 %v368_v46, %v362_v44  ;;  %v370_v48 = vpop.f32.mrb[15].mxu0  ;;  %1065 = vmatpush1.bf16.msra.mxu1 %v1064_v41  ;;  %1095 = vmatprep.subr.bf16.mxu0 %v1094_v33  ;;  %v631_v41 = vld [vmem:[%s1519_s5 + $0x78] sm:$0xff] }
 0x117   :  { %v1066_v49 = vpack.c.bf16 %v370_v48, %v364_v45  ;;  %v1100_v42 = vpack.c.bf16 %v631_v41, %v630_v40 }
 0x119   :  { %1067 = vmatprep.subr.bf16.mxu1 %v1066_v49  ;;  %1097 = vmatpush3.bf16.msra.mxu0 %v1096_v36 }
 0x11a   :  { %1069 = vmatpush1.bf16.msra.mxu1 %v1068_v47  ;;  %1099 = vmatprep.subr.bf16.mxu0 %v1098_v39 }
 0x11d   :  { %952 = vmatmul.mubr.msk.f32.vlgmr.msra.gmra.mrb[8].mxu1 %vm381_vm1, %v373_v50  ;;  %1101 = vmatpush3.bf16.msra.mxu0 %v1100_v42 }
 0x11e   :  { %476 = vmatprep.mubr.f32.mxu1 %v1162_v0 }
 0x121   :  { %953 = vmatmul.mubr.msk.f32.gmra.mrb[10].mxu1 %vm381_vm1, %v374_v51 }
 0x122   :  { %482 = vmatprep.mubr.f32.mxu1 %v1162_v0 }
 0x125   :  { %954 = vmatmul.mubr.msk.f32.gmra.mrb[12].mxu1 %vm381_vm1, %v375_v52 }
 0x126   :  { %488 = vmatprep.mubr.f32.mxu1 %v1162_v0 }
 0x129   :  { %955 = vmatmul.mubr.msk.f32.gmra.mrb[14].mxu1 %vm381_vm1, %v376_v53 }
 0x12a   :  { %494 = vmatprep.mubr.f32.mxu1 %v1162_v0 }
 0x12d   :  { %956 = vmatmul.mubr.msk.f32.gmra.mrb[16].mxu1 %vm381_vm1, %v377_v54 }
 0x12e   :  { %500 = vmatprep.mubr.f32.mxu1 %v1162_v0 }
 0x131   :  { %957 = vmatmul.mubr.msk.f32.gmra.mrb[18].mxu1 %vm381_vm1, %v378_v55 }
 0x132   :  { %506 = vmatprep.mubr.f32.mxu1 %v1162_v0 }
 0x135   :  { %958 = vmatmul.mubr.msk.f32.gmra.mrb[20].mxu1 %vm381_vm1, %v379_v56 }
 0x136   :  { %512 = vmatprep.mubr.f32.mxu1 %v1162_v0 }
 0x139   :  { %959 = vmatmul.mubr.msk.f32.gmra.mrb[22].mxu1 %vm381_vm1, %v380_v57 }
 0x1f0   :  { %v1390_v43 = vpop.f32.mrb[8].mxu1 }
 0x1f1   :  { %v1392_v44 = vpop.f32.mrb[9].mxu1  ;;  %v537_v46 = vmul.f32 %v1390_v43, %v1390_v43 }
 0x1f2   :  { %v538_v50 = vmul.f32 %v1392_v44, %v1392_v44 }
 0x1f4   :  { %v1394_v45 = vpop.f32.mrb[10].mxu1 }
 0x1f5   :  { %v519_v47 = vadd.f32 %v1394_v45, %v1390_v43  ;;  %v539_v48 = vmul.f32 %v1394_v45, %v1394_v45  ;;  %v1402_v49 = vpop.f32.mrb[11].mxu1 }
 0x1f6   :  { %v528_v51 = vadd.f32 %v1402_v49, %v1392_v44  ;;  %v540_v52 = vmul.f32 %v1402_v49, %v1402_v49 }
 0x1f7   :  { %v545_v53 = vadd.f32 %v539_v48, %v537_v46 }
 0x1f8   :  { %v554_v54 = vadd.f32 %v540_v52, %v538_v50  ;;  %v1410_v55 = vpop.f32.mrb[12].mxu1 }
 0x1f9   :  { %v520_v56 = vadd.f32 %v519_v47, %v1410_v55  ;;  %v541_v57 = vmul.f32 %v1410_v55, %v1410_v55  ;;  %v1415_v58 = vpop.f32.mrb[13].mxu1 }
 0x1fa   :  { %v529_v59 = vadd.f32 %v528_v51, %v1415_v58  ;;  %v542_v60 = vmul.f32 %v1415_v58, %v1415_v58 }
 0x1fb   :  { %v546_v61 = vadd.f32 %v545_v53, %v541_v57 }
 0x1fc   :  { %v555_v62 = vadd.f32 %v554_v54, %v542_v60  ;;  %v1420_v63 = vpop.f32.mrb[14].mxu1 }
 0x1fd   :  { %v521_v1 = vadd.f32 %v520_v56, %v1420_v63  ;;  %v543_v2 = vmul.f32 %v1420_v63, %v1420_v63  ;;  %v1425_v3 = vpop.f32.mrb[15].mxu1 }
 0x1fe   :  { %v530_v4 = vadd.f32 %v529_v59, %v1425_v3  ;;  %v544_v5 = vmul.f32 %v1425_v3, %v1425_v3 }
 0x1ff   :  { %v547_v6 = vadd.f32 %v546_v61, %v543_v2  ;;  %v522_v10 = vrot.slane %v521_v1, 4 }
 0x200   :  { %v556_v7 = vadd.f32 %v555_v62, %v544_v5  ;;  %v1430_v8 = vpop.f32.mrb[16].mxu1  ;;  %v531_v12 = vrot.slane %v530_v4, 4 }
 0x201   :  { %v1432_v9 = vpop.f32.mrb[17].mxu1  ;;  %v581_v13 = vmul.f32 %v1430_v8, %v1430_v8  ;;  %v548_v17 = vrot.slane %v547_v6, 4  ;;  %v523_v25 = vadd.f32 %v522_v10, %v521_v1 }
 0x202   :  { %v582_v18 = vmul.f32 %v1432_v9, %v1432_v9  ;;  %v557_v21 = vrot.slane %v556_v7, 4  ;;  %v532_v30 = vadd.f32 %v531_v12, %v530_v4 }
 0x203   :  { %v549_v29 = vadd.f32 %v548_v17, %v547_v6  ;;  %v524_v37 = vrot.slane %v523_v25, 2 }
 0x204   :  { %v1434_v11 = vpop.f32.mrb[18].mxu1  ;;  %v558_v33 = vadd.f32 %v557_v21, %v556_v7  ;;  %v533_v42 = vrot.slane %v532_v30, 2 }
 0x205   :  { %v563_v14 = vadd.f32 %v1434_v11, %v1430_v8  ;;  %v583_v15 = vmul.f32 %v1434_v11, %v1434_v11  ;;  %v1442_v16 = vpop.f32.mrb[19].mxu1  ;;  %v550_v41 = vrot.slane %v549_v29, 2  ;;  %v525_v54 = vadd.f32 %v524_v37, %v523_v25 }
 0x206   :  { %v572_v19 = vadd.f32 %v1442_v16, %v1432_v9  ;;  %v584_v20 = vmul.f32 %v1442_v16, %v1442_v16  ;;  %v559_v48 = vrot.slane %v558_v33, 2  ;;  %v534_v60 = vadd.f32 %v533_v42, %v532_v30 }
 0x207   :  { %v589_v22 = vadd.f32 %v583_v15, %v581_v13  ;;  %v551_v59 = vadd.f32 %v550_v41, %v549_v29  ;;  %v526_v7 = vrot.slane %v525_v54, 1 }
 0x208   :  { %v598_v23 = vadd.f32 %v584_v20, %v582_v18  ;;  %v1450_v24 = vpop.f32.mrb[20].mxu1  ;;  %v560_v1 = vadd.f32 %v559_v48, %v558_v33 }
 0x209   :  { %v564_v26 = vadd.f32 %v563_v14, %v1450_v24  ;;  %v585_v27 = vmul.f32 %v1450_v24, %v1450_v24  ;;  %v1455_v28 = vpop.f32.mrb[21].mxu1  ;;  %v552_v13 = vrot.slane %v551_v59, 1  ;;  %v535_v14 = vrot.slane %v534_v60, 1 }
 0x20a   :  { %v573_v31 = vadd.f32 %v572_v19, %v1455_v28  ;;  %v586_v32 = vmul.f32 %v1455_v28, %v1455_v28  ;;  %v561_v20 = vrot.slane %v560_v1, 1 }
 0x20b   :  { %v590_v34 = vadd.f32 %v589_v22, %v585_v27  ;;  %v553_v27 = vadd.f32 %v552_v13, %v551_v59  ;;  %v536_v29 = vadd.f32 %v535_v14, %v534_v60 }
 0x20c   :  { %v599_v35 = vadd.f32 %v598_v23, %v586_v32  ;;  %v1460_v36 = vpop.f32.mrb[22].mxu1  ;;  %v527_v23 = vadd.f32 %v526_v7, %v525_v54  ;;  %v562_v32 = vadd.f32 %v561_v20, %v560_v1 }
 0x20d   :  { %v565_v38 = vadd.f32 %v564_v26, %v1460_v36  ;;  %v587_v39 = vmul.f32 %v1460_v36, %v1460_v36  ;;  %v1465_v40 = vpop.f32.mrb[23].mxu1 }
 0x20e   :  { %v574_v46 = vadd.f32 %v573_v31, %v1465_v40  ;;  %v588_v47 = vmul.f32 %v1465_v40, %v1465_v40 }
 0x20f   :  { %v566_v50 = vrot.slane %v565_v38, 4  ;;  %v591_v51 = vadd.f32 %v590_v34, %v587_v39 }
 0x210   :  { %v575_v52 = vrot.slane %v574_v46, 4  ;;  %v600_v53 = vadd.f32 %v599_v35, %v588_v47  ;;  %v750_v47 = vld [vmem:[%s1520_s6] sm:$0xff] }
 0x211   :  { %v567_v56 = vadd.f32 %v566_v50, %v565_v38  ;;  %v592_v57 = vrot.slane %v591_v51, 4 }
 0x212   :  { %v576_v61 = vadd.f32 %v575_v52, %v574_v46  ;;  %v601_v62 = vrot.slane %v600_v53, 4  ;;  %v751_v46 = vld [vmem:[%s1520_s6 + $0x8] sm:$0xff] }
 0x213   :  { %v568_v2 = vrot.slane %v567_v56, 2  ;;  %v593_v4 = vadd.f32 %v592_v57, %v591_v51  ;;  %756 = vmatprep.subr.mxu0 %v751_v46 }
 0x214   :  { %v577_v5 = vrot.slane %v576_v61, 2  ;;  %v602_v6 = vadd.f32 %v601_v62, %v600_v53  ;;  %v961_v62 = vld [vmem:[%s1518_s4] ss:$0 sm:$0xff] }
 0x215   :  { %v569_v10 = vadd.f32 %v568_v2, %v567_v56  ;;  %v594_v12 = vrot.slane %v593_v4, 2 }
 0x216   :  { %v578_v15 = vadd.f32 %v577_v5, %v576_v61  ;;  %v603_v17 = vrot.slane %v602_v6, 2 }
 0x217   :  { %v570_v18 = vrot.slane %v569_v10, 1  ;;  %v595_v19 = vadd.f32 %v594_v12, %v593_v4 }
 0x218   :  { %v579_v21 = vrot.slane %v578_v15, 1  ;;  %v604_v22 = vadd.f32 %v603_v17, %v602_v6  ;;  %v827_v6 = vlaneseq }
 0x219   :  { %v571_v25 = vadd.f32 %v570_v18, %v569_v10  ;;  %v596_v26 = vrot.slane %v595_v19, 1 }
 0x21a   :  { %v580_v30 = vadd.f32 %v579_v21, %v578_v15  ;;  %v605_v31 = vrot.slane %v604_v22, 1  ;;  %v828_v7 = vshrl.u32 %v827_v6, 7 }
 0x21b   :  { %v597_v33 = vadd.f32 %v596_v26, %v595_v19  ;;  %v608_v34 = vsel %vm607_vm2, %v527_v23, %v571_v25 }
 0x21c   :  { %v606_v35 = vadd.f32 %v605_v31, %v604_v22  ;;  %v609_v37 = vsel %vm607_vm2, %v536_v29, %v580_v30  ;;  %v611_v38 = vsel %vm610_vm3, %v608_v34, %v553_v27  ;;  %v829_v10 = vsub.s32 0, %v828_v7 }
 0x21d   :  { %v612_v39 = vsel %vm610_vm3, %v609_v37, %v562_v32  ;;  %v614_v41 = vsel %vm613_vm4, %v611_v38, %v597_v33  ;;  %v845_v12 = vsub.s32 2, %v828_v7  ;;  %v877_v13 = vsub.s32 1, %v828_v7 }
 0x21e   :  { %v615_v42 = vsel %vm613_vm4, %v612_v39, %v606_v35  ;;  %v893_v14 = vsub.s32 3, %v828_v7 }
 0x21f   :  { %712 = vmatprep.mubr.f32.mxu0 %v615_v42 }
 0x220   :  { %713 = vmatmul.mubr.f32.vlgmr.msra.gmra.mrb[16].mxu0 %v614_v41 }
 0x221   :  { %820 = vmatprep.mubr.f32.mxu0 %v1162_v0  ;;  %757 = vmatpush1.msra.mxu0 %v750_v47  ;;  %v960_v0 = vld [vmem:[%s1517_s3] ss:$0 sm:$0xff]  ;;  %s1163_s3 = smov [#allocation5]  }
 0x222   :  { %s928_s4 = sshll.u32 %s1163_s3, 4  ;;  %s929_s4 = int_to_ptr.vmem [resolvable:$true] %s928_s4 }
 0x223   :  { %s1133_s29 = scalar_lea.vmem %s929_s4, 2048  ;;  %p1138_p9 = scmp.lt.s32.totalorder %s929_s4, %s929_s4 }
 0x224   :  { %p1134_p8 = scmp.ne.s32.totalorder %s929_s4, %s1133_s29  ;;  %p1139_p10 = scmp.lt.s32.totalorder %s1133_s29, %s1133_s29 }
 0x226   :  { %p1140_p11 = por %p1139_p10, %p1138_p9 }
 0x228   :  { %p1141_p12 = pnand %p1140_p11, %p1134_p8 }
 0x2f3   :  { %v995_v48 = vpop.f32.mrb[16].mxu0 }
 0x2f4   :  { %v996_v50 = vpop.f32.mrb[17].mxu0 }
 0x2f5   :  { %v997_v51 = vadd.f32 %v996_v50, %v995_v48 }
 0x2f7   :  { %v718_v52 = vmul.f32 0.0009765625, %v997_v51 }
 0x2f9   :  { %v719_v53 = vmul.f32 %v718_v52, %v718_v52 }
 0x2fb   :  { %v721_v54 = vrot.slane %v719_v53, 6 }
 0x2fd   :  { %v723_v56 = vsub.f32 %v718_v52, %v721_v54 }
 0x2ff   :  { %v725_v57 = vadd.f32 1e-05, %v723_v56 }
 0x301   :  { %1109 = vrsqrt.f32 %v725_v57 }
 0x30b   :  { %v1110_v59 = vpop.eup %1109 }
 0x30c   :  { %v733_v60 = vmul.f32 %v1110_v59, %v960_v0 }
 0x30e   :  { %v736_v61 = vrot.slane %v733_v60, 2 }
 0x310   :  { %v738_v1 = vmul.f32 %v736_v61, %v718_v52 }
 0x312   :  { %v745_v2 = vsub.f32 %v961_v62, %v738_v1 }
 0x314   :  { %v747_v4 = vrot.slane %v745_v2, 6 }
 0x316   :  { %v749_v5 = vsel %vm610_vm3, %v736_v61, %v747_v4 }
 0x317   :  { %962 = vmatmul.mubr.msk.f32.vlgmr.msra.gmra.mrb[18].mxu0 %vm752_vm5, %v749_v5 }
 0x3ea   :  { %v822_v15 = vpop.f32.mrb[18].mxu0 }
 0x3eb   :  { %v824_v17 = vpop.f32.mrb[19].mxu0  ;;  %v830_v18 = vrot.slane %v822_v15, %v829_v10  ;;  %v846_v19 = vrot.slane %v822_v15, %v845_v12  ;;  %v878_v20 = vrot.slane %v822_v15, %v877_v13  ;;  %v894_v21 = vrot.slane %v822_v15, %v893_v14 }
 0x3ec   :  { %v834_v22 = vrot.slane %v824_v17, %v829_v10  ;;  %v850_v23 = vrot.slane %v824_v17, %v845_v12  ;;  %v882_v25 = vrot.slane %v824_v17, %v877_v13  ;;  %v898_v26 = vrot.slane %v824_v17, %v893_v14 }
 0x3ed   :  { %v835_v27 = vmul.f32 %v830_v18, %v1390_v43  ;;  %v837_v29 = vmul.f32 %v830_v18, %v1394_v45  ;;  %v839_v30 = vmul.f32 %v830_v18, %v1410_v55  ;;  %v841_v31 = vmul.f32 %v830_v18, %v1420_v63 }
 0x3ee   :  { %v836_v32 = vmul.f32 %v834_v22, %v1392_v44  ;;  %v838_v33 = vmul.f32 %v834_v22, %v1402_v49  ;;  %v840_v34 = vmul.f32 %v834_v22, %v1415_v58  ;;  %v842_v35 = vmul.f32 %v834_v22, %v1425_v3 }
 0x3ef   :  { %v851_v37 = vadd.f32 %v846_v19, %v835_v27  ;;  %v853_v38 = vadd.f32 %v846_v19, %v837_v29  ;;  %v855_v39 = vadd.f32 %v846_v19, %v839_v30  ;;  %v857_v41 = vadd.f32 %v846_v19, %v841_v31 }
 0x3f0   :  { %v852_v42 = vadd.f32 %v850_v23, %v836_v32  ;;  %v854_v43 = vadd.f32 %v850_v23, %v838_v33  ;;  %v856_v46 = vadd.f32 %v850_v23, %v840_v34  ;;  %v858_v45 = vadd.f32 %v850_v23, %v842_v35 }
 0x3f1   :  { %v859_v47 = vmax.f32 %v851_v37, 0.0  ;;  %v861_v55 = vmax.f32 %v853_v38, 0.0  ;;  %v863_v48 = vmax.f32 %v855_v39, 0.0  ;;  %v865_v63 = vmax.f32 %v857_v41, 0.0 }
 0x3f2   :  { %v860_v50 = vmax.f32 %v852_v42, 0.0  ;;  %v862_v44 = vmax.f32 %v854_v43, 0.0  ;;  %v864_v51 = vmax.f32 %v856_v46, 0.0  ;;  %v866_v49 = vmax.f32 %v858_v45, 0.0 }
 0x3f3   :  { %867 = vst [vmem:[#allocation5] sm:$0xff] %v859_v47  ;;  %869 = vst [vmem:[#allocation5 + $0x10] sm:$0xff] %v861_v55  ;;  %v883_v58 = vmul.f32 %v878_v20, %v1430_v8  ;;  %v884_v3 = vmul.f32 %v882_v25, %v1432_v9  ;;  %v885_v52 = vmul.f32 %v878_v20, %v1434_v11 }
 0x3f4   :  { %871 = vst [vmem:[#allocation5 + $0x20] sm:$0xff] %v863_v48  ;;  %873 = vst [vmem:[#allocation5 + $0x30] sm:$0xff] %v865_v63  ;;  %v886_v53 = vmul.f32 %v882_v25, %v1442_v16  ;;  %v887_v54 = vmul.f32 %v878_v20, %v1450_v24  ;;  %v888_v56 = vmul.f32 %v882_v25, %v1455_v28 }
 0x3f5   :  { %868 = vst [vmem:[#allocation5 + $0x8] sm:$0xff] %v860_v50  ;;  %870 = vst [vmem:[#allocation5 + $0x18] sm:$0xff] %v862_v44  ;;  %v889_v57 = vmul.f32 %v878_v20, %v1460_v36  ;;  %v890_v0 = vmul.f32 %v882_v25, %v1465_v40  ;;  %v899_v59 = vadd.f32 %v894_v21, %v883_v58 }
 0x3f6   :  { %872 = vst [vmem:[#allocation5 + $0x28] sm:$0xff] %v864_v51  ;;  %874 = vst [vmem:[#allocation5 + $0x38] sm:$0xff] %v866_v49  ;;  %v900_v8 = vadd.f32 %v898_v26, %v884_v3  ;;  %v901_v60 = vadd.f32 %v894_v21, %v885_v52  ;;  %v902_v9 = vadd.f32 %v898_v26, %v886_v53 }
 0x3f7   :  { %v903_v11 = vadd.f32 %v894_v21, %v887_v54  ;;  %v904_v16 = vadd.f32 %v898_v26, %v888_v56  ;;  %v905_v61 = vadd.f32 %v894_v21, %v889_v57  ;;  %v906_v62 = vadd.f32 %v898_v26, %v890_v0 }
 0x3f8   :  { %v907_v1 = vmax.f32 %v899_v59, 0.0  ;;  %v908_v2 = vmax.f32 %v900_v8, 0.0  ;;  %v909_v4 = vmax.f32 %v901_v60, 0.0  ;;  %v910_v24 = vmax.f32 %v902_v9, 0.0 }
 0x3f9   :  { %v911_v5 = vmax.f32 %v903_v11, 0.0  ;;  %v912_v28 = vmax.f32 %v904_v16, 0.0  ;;  %v913_v6 = vmax.f32 %v905_v61, 0.0  ;;  %v914_v36 = vmax.f32 %v906_v62, 0.0 }
 0x3fa   :  { %915 = vst [vmem:[#allocation5 + $0x40] sm:$0xff] %v907_v1  ;;  %916 = vst [vmem:[#allocation5 + $0x48] sm:$0xff] %v908_v2 }
 0x3fb   :  { %917 = vst [vmem:[#allocation5 + $0x50] sm:$0xff] %v909_v4  ;;  %918 = vst [vmem:[#allocation5 + $0x58] sm:$0xff] %v910_v24 }
 0x3fc   :  { %919 = vst [vmem:[#allocation5 + $0x60] sm:$0xff] %v911_v5  ;;  %920 = vst [vmem:[#allocation5 + $0x68] sm:$0xff] %v912_v28 }
 0x3fd   :  { %921 = vst [vmem:[#allocation5 + $0x70] sm:$0xff] %v913_v6  ;;  %922 = vst [vmem:[#allocation5 + $0x78] sm:$0xff] %v914_v36 }
 0x3fe   :  { %1144 = shalt.err (!%p1141_p12)
}
 0x3ff   :  { %s1145_s9 = scalar_lea.hbm %s1521_s7, 2048 }
 0x400   :  { %p1146_p13 = scmp.ne.s32.totalorder %s1521_s7, %s1145_s9  ;;  %p1149_p0 = scmp.lt.u32.totalorder %s1145_s9, %s1521_s7 }
 0x402   :  { %p1151_p1 = pnand %p1149_p0, %p1146_p13 }
 0x404   :  { %1154 = shalt.err (!%p1151_p1)
}
 0x405   :  { %s1164_s14 = smov 256   ;;  %s1165_s1 = smov 16  }
 0x406   :  { %934 = dma.vmem_to_hbm [thread:$0]  %s929_s4, 2048, %s1521_s7, [#allocation4], %s1164_s14, %s1164_s14, %s1165_s1  }
 0x407   :  { %1157 = dma.done.wait [#allocation4], 2048  }
 0x408   :  { %1158 = vsyncadd [#allocation4], 4294965248 }
 0x409   :  { %938 = vsyncpa [#allocation3], 1 }
 0x40a   :  { %939 = vsyncpa [#allocation4], 1 }

</bundles_post_ra>
